<compile_context>
chip_gen: v5e
topology: v5e:2x2
jax: 0.10.0
libtpu: 0.0.40
codegen_flags: <defaults>
</compile_context>

<pallas_src>
import math

import jax
import jax.numpy as jnp
from jax.experimental import pallas as pl
from jax.experimental.pallas import tpu as pltpu

LANE = 128
SUBLANE = 8


def _round_up(x, m):
    return (x + m - 1) // m * m


def _pad_rows(a, rows):
    return a if a.shape[0] == rows else jnp.pad(a, ((0, rows - a.shape[0]), (0, 0)))


# ----------------------------------------------------------------------------
# One-time parameter preprocessing (keep OUT of the per-step hot path).
# ----------------------------------------------------------------------------
def prepare_params(w_x2h, b_x2h, w_h2h, b_h2h, *, param_dtype=jnp.float32):
    """Transpose / fold / gate-repack the PyTorch Linear parameters once.

    w_x2h: (4H, I), b_x2h: (4H,), w_h2h: (4H, H), b_h2h: (4H,)
    Produces:
      w_cat : (I+H, 4*Hp)  stacked [Wx; Wh] for the fused single-step matmul
      wx    : (I,   4*Hp)  for the fused-sequence input projection
      wh    : (Hp,  4*Hp)  h2h weight (rows padded to Hp), VMEM-resident
      bias  : (1,   4*Hp)  folded bias (b_x2h + b_h2h), f32
    Gate g occupies lane-aligned columns [g*Hp, g*Hp + H); padding is zero.
    """
    four_h, I = w_x2h.shape
    H = four_h // 4
    Hp = _round_up(H, LANE)
    pad = Hp - H

    def pack_cols(w_t):  # (K, 4H) -> (K, 4*Hp), gate-major, lane-aligned
        K = w_t.shape[0]
        w4 = w_t.reshape(K, 4, H)
        w4 = jnp.pad(w4, ((0, 0), (0, 0), (0, pad)))
        return w4.reshape(K, 4 * Hp)

    wx = pack_cols(jnp.transpose(w_x2h))                   # (I,  4*Hp)
    wh = pack_cols(jnp.transpose(w_h2h))                   # (H,  4*Hp)
    wh_p = jnp.pad(wh, ((0, pad), (0, 0)))                 # (Hp, 4*Hp)
    w_cat = jnp.concatenate([wx, wh], axis=0)              # (I+H, 4*Hp)

    b = (b_x2h + b_h2h).reshape(4, H)
    b = jnp.pad(b, ((0, 0), (0, pad))).reshape(1, 4 * Hp)  # (1, 4*Hp)

    return dict(
        w_cat=w_cat.astype(param_dtype),
        wx=wx.astype(param_dtype),
        wh=wh_p.astype(param_dtype),
        bias=b.astype(jnp.float32),
        I=I, H=H, Hp=Hp,
    )


# ----------------------------------------------------------------------------
# Single LSTMCell step (matches the PyTorch module forward).
# ----------------------------------------------------------------------------
def _lstm_cell_kernel(xh_ref, cx_ref, w_ref, b_ref, hy_ref, cy_ref):
    Hp = hy_ref.shape[1]
    # One fused MXU matmul over [x | hx], f32 accumulation, bias folded in.
    gates = jnp.dot(xh_ref[...], w_ref[...],
                    preferred_element_type=jnp.float32) + b_ref[...]
    # Gate-major, 128-lane-aligned slices (no cross-lane relayout).
    forget_gate = jax.nn.sigmoid(gates[:, 0 * Hp:1 * Hp])
    input_gate = jax.nn.sigmoid(gates[:, 1 * Hp:2 * Hp])
    cell_gate = jnp.tanh(gates[:, 2 * Hp:3 * Hp])
    out_gate = jax.nn.sigmoid(gates[:, 3 * Hp:4 * Hp])

    cy = forget_gate * cx_ref[...].astype(jnp.float32) + input_gate * cell_gate
    hy = out_gate * jnp.tanh(cy)

    cy_ref[...] = cy.astype(cy_ref.dtype)   # full-lane (Hp) unmasked stores
    hy_ref[...] = hy.astype(hy_ref.dtype)


def lstm_cell_forward(x, hx, cx, params):
    """One LSTM cell step. Returns (hy, cy), each (B, H)."""
    B = x.shape[0]
    Bp = _round_up(B, SUBLANE)
    I, H, Hp = params["I"], params["H"], params["Hp"]
    w_cat, bias = params["w_cat"], params["bias"]

    # Tiny activation-side glue only (B*(I+H) elems); weight glue is pre-done.
    xh = jnp.concatenate([x, hx], axis=1).astype(w_cat.dtype)       # (B, I+H)
    xh = _pad_rows(xh, Bp)                                          # (Bp, I+H)
    cxp = cx if Hp == H else jnp.pad(cx, ((0, 0), (0, Hp - H)))
    cxp = _pad_rows(cxp, Bp)                                        # (Bp, Hp)

    full = lambda a: pl.BlockSpec(a.shape, lambda: (0,) * a.ndim)

    bytes_accessed = int(xh.size * xh.dtype.itemsize
                         + w_cat.size * w_cat.dtype.itemsize
                         + bias.size * 4 + cxp.size * 4 + 2 * Bp * Hp * 4)
    cost = pl.CostEstimate(flops=2 * Bp * (I + H) * 4 * Hp,
                           transcendentals=5 * Bp * Hp,
                           bytes_accessed=bytes_accessed)

    hy_p, cy_p = pl.pallas_call(
        _lstm_cell_kernel,
        out_shape=(jax.ShapeDtypeStruct((Bp, Hp), x.dtype),
                   jax.ShapeDtypeStruct((Bp, Hp), x.dtype)),
        in_specs=[full(xh), full(cxp), full(w_cat), full(bias)],
        out_specs=(pl.BlockSpec((Bp, Hp), lambda: (0, 0)),
                   pl.BlockSpec((Bp, Hp), lambda: (0, 0))),
        cost_estimate=cost,
    )(xh, cxp, w_cat, bias)

    return hy_p[:B, :H], cy_p[:B, :H]


# ----------------------------------------------------------------------------
# Fused sequence: T timesteps in ONE pallas_call (resident Wh, state in VMEM).
# ----------------------------------------------------------------------------
def _lstm_seq_kernel(gx_ref, wh_ref, h0_ref, c0_ref, hs_ref, cs_ref,
                     h_scr, c_scr):
    Hp = h_scr.shape[1]

    @pl.when(pl.program_id(0) == 0)
    def _():
        h_scr[...] = h0_ref[...].astype(jnp.float32)
        c_scr[...] = c0_ref[...].astype(jnp.float32)

    # gx already contains x@Wx + bias (computed once, outside, for all T).
    gates = gx_ref[0].astype(jnp.float32) + jnp.dot(
        h_scr[...].astype(wh_ref.dtype), wh_ref[...],
        preferred_element_type=jnp.float32)

    forget_gate = jax.nn.sigmoid(gates[:, 0 * Hp:1 * Hp])
    input_gate = jax.nn.sigmoid(gates[:, 1 * Hp:2 * Hp])
    cell_gate = jnp.tanh(gates[:, 2 * Hp:3 * Hp])
    out_gate = jax.nn.sigmoid(gates[:, 3 * Hp:4 * Hp])

    c_new = forget_gate * c_scr[...] + input_gate * cell_gate
    h_new = out_gate * jnp.tanh(c_new)

    # Carry recurrent state in VMEM scratch across grid steps (no HBM trip).
    c_scr[...] = c_new
    h_scr[...] = h_new
    hs_ref[0] = h_new.astype(hs_ref.dtype)
    cs_ref[0] = c_new.astype(cs_ref.dtype)


def lstm_sequence_forward(xs, h0, c0, params):
    """Run T LSTM cell steps fused into a single pallas_call.

    xs: (T, B, I). Returns (hs, cs), each (T, B, H); hs[-1]/cs[-1] are final.
    """
    T, B, I = xs.shape
    Bp = _round_up(B, SUBLANE)
    H, Hp = params["H"], params["Hp"]
    wx, wh, bias = params["wx"], params["wh"], params["bias"]

    # Input projection for ALL timesteps in one big (non-recurrent) matmul.
    gx = (jnp.dot(xs.reshape(T * B, I).astype(wx.dtype), wx,
                  preferred_element_type=jnp.float32)
          .reshape(T, B, 4 * Hp) + bias)                      # (T, B, 4*Hp) f32
    if Bp != B:
        gx = jnp.pad(gx, ((0, 0), (0, Bp - B), (0, 0)))       # padded rows -> 0

    h0p = h0 if Hp == H else jnp.pad(h0, ((0, 0), (0, Hp - H)))
    c0p = c0 if Hp == H else jnp.pad(c0, ((0, 0), (0, Hp - H)))
    h0p = _pad_rows(h0p, Bp)
    c0p = _pad_rows(c0p, Bp)

    cost = pl.CostEstimate(
        flops=2 * T * Bp * Hp * 4 * Hp,
        transcendentals=5 * T * Bp * Hp,
        bytes_accessed=int(gx.size * 4 + wh.size * wh.dtype.itemsize
                           + 2 * Bp * Hp * 4 + 2 * T * Bp * Hp * 4))

    hs_p, cs_p = pl.pallas_call(
        _lstm_seq_kernel,
        out_shape=(jax.ShapeDtypeStruct((T, Bp, Hp), xs.dtype),
                   jax.ShapeDtypeStruct((T, Bp, Hp), xs.dtype)),
        grid_spec=pltpu.PrefetchScalarGridSpec(
            num_scalar_prefetch=0,
            grid=(T,),
            in_specs=[
                pl.BlockSpec((1, Bp, 4 * Hp), lambda t: (t, 0, 0)),  # gx_t
                pl.BlockSpec((Hp, 4 * Hp), lambda t: (0, 0)),        # Wh resident
                pl.BlockSpec((Bp, Hp), lambda t: (0, 0)),            # h0
                pl.BlockSpec((Bp, Hp), lambda t: (0, 0)),            # c0
            ],
            out_specs=[
                pl.BlockSpec((1, Bp, Hp), lambda t: (t, 0, 0)),
                pl.BlockSpec((1, Bp, Hp), lambda t: (t, 0, 0)),
            ],
            scratch_shapes=[pltpu.VMEM((Bp, Hp), jnp.float32),
                            pltpu.VMEM((Bp, Hp), jnp.float32)],
        ),
        compiler_params=pltpu.CompilerParams(
            dimension_semantics=("arbitrary",)),   # sequential: carried state
        cost_estimate=cost,
    )(gx, wh, h0p, c0p)

    return hs_p[:, :B, :H], cs_p[:, :B, :H]


# ----------------------------------------------------------------------------
# Pure-JAX references.
# ----------------------------------------------------------------------------
def _reference(x, hx, cx, w_x2h, b_x2h, w_h2h, b_h2h):
    H = hx.shape[1]
    gates = x @ w_x2h.T + b_x2h + hx @ w_h2h.T + b_h2h
    f = jax.nn.sigmoid(gates[:, 0:H])
    i = jax.nn.sigmoid(gates[:, H:2 * H])
    g = jnp.tanh(gates[:, 2 * H:3 * H])
    o = jax.nn.sigmoid(gates[:, 3 * H:4 * H])
    cy = f * cx + i * g
    hy = o * jnp.tanh(cy)
    return hy, cy


def _reference_sequence(xs, h0, c0, w_x2h, b_x2h, w_h2h, b_h2h):
    h, c = h0, c0
    hs, cs = [], []
    for t in range(xs.shape[0]):
        h, c = _reference(xs[t], h, c, w_x2h, b_x2h, w_h2h, b_h2h)
        hs.append(h)
        cs.append(c)
    return jnp.stack(hs), jnp.stack(cs)


if __name__ == "__main__":
    B, INPUT, HIDDEN, T = 8, 16, 32, 8
    std = 1.0 / math.sqrt(HIDDEN)

    key = jax.random.PRNGKey(0)
    k = jax.random.split(key, 8)
    x = jax.random.normal(k[0], (B, INPUT), jnp.float32)
    hx = jax.random.normal(k[1], (B, HIDDEN), jnp.float32)
    cx = jax.random.normal(k[2], (B, HIDDEN), jnp.float32)
    xs = jax.random.normal(k[7], (T, B, INPUT), jnp.float32)

    # Deterministic init mirroring reset_parameters(): U(-std, std)
    w_x2h = jax.random.uniform(k[3], (4 * HIDDEN, INPUT), jnp.float32, -std, std)
    b_x2h = jax.random.uniform(k[4], (4 * HIDDEN,), jnp.float32, -std, std)
    w_h2h = jax.random.uniform(k[5], (4 * HIDDEN, HIDDEN), jnp.float32, -std, std)
    b_h2h = jax.random.uniform(k[6], (4 * HIDDEN,), jnp.float32, -std, std)

    # One-time packing. Use param_dtype=jnp.bfloat16 on v6e/v7x for the
    # MXU-native bf16 path; f32 kept here for exact correctness checking.
    params = prepare_params(w_x2h, b_x2h, w_h2h, b_h2h,
                            param_dtype=jnp.float32)

    # --- single cell step (the module's forward) ---
    hy, cy = lstm_cell_forward(x, hx, cx, params)
    jax.block_until_ready((hy, cy))
    hy_ref, cy_ref = _reference(x, hx, cx, w_x2h, b_x2h, w_h2h, b_h2h)
    assert jnp.allclose(hy, hy_ref, atol=1e-5, rtol=1e-5), "hy mismatch"
    assert jnp.allclose(cy, cy_ref, atol=1e-5, rtol=1e-5), "cy mismatch"

    # --- fused T-step recurrence in one pallas_call ---
    hs, cs = lstm_sequence_forward(xs, hx, cx, params)
    jax.block_until_ready((hs, cs))
    hs_ref, cs_ref = _reference_sequence(xs, hx, cx, w_x2h, b_x2h, w_h2h, b_h2h)
    assert jnp.allclose(hs, hs_ref, atol=1e-4, rtol=1e-4), "sequence h mismatch"
    assert jnp.allclose(cs, cs_ref, atol=1e-4, rtol=1e-4), "sequence c mismatch"

    print("KERNEL_OK")
</pallas_src>

<mosaic_0001>
module attributes {stable_mosaic.version = 11 : i64} {
  func.func @_lstm_cell_kernel(%arg0: memref<8x48xf32, #tpu.memory_space<vmem>>, %arg1: memref<8x128xf32, #tpu.memory_space<vmem>>, %arg2: memref<48x512xf32, #tpu.memory_space<vmem>>, %arg3: memref<1x512xf32, #tpu.memory_space<vmem>>, %arg4: memref<8x128xf32, #tpu.memory_space<vmem>>, %arg5: memref<8x128xf32, #tpu.memory_space<vmem>>) attributes {dimension_semantics = [], scalar_prefetch = 0 : i64, scratch_operands = 0 : i64, tpu.core_type = #tpu.core_type<tc>} {
    %c0 = arith.constant 0 : index
    %c0_0 = arith.constant 0 : index
    %0 = vector.load %arg0[%c0, %c0_0] : memref<8x48xf32, #tpu.memory_space<vmem>>, vector<8x48xf32>
    %c0_1 = arith.constant 0 : index
    %c0_2 = arith.constant 0 : index
    %1 = vector.load %arg2[%c0_1, %c0_2] : memref<48x512xf32, #tpu.memory_space<vmem>>, vector<48x512xf32>
    %cst = arith.constant dense<0.000000e+00> : vector<8x512xf32>
    %2 = tpu.matmul %0, %1, %cst {dimension_numbers = #tpu.dot_dimension_numbers<[1], [0], [0], [1], [0, 0, 1, 1], [], []>} : vector<8x48xf32>, vector<48x512xf32>, vector<8x512xf32> -> vector<8x512xf32>
    %c0_3 = arith.constant 0 : index
    %c0_4 = arith.constant 0 : index
    %3 = vector.load %arg3[%c0_3, %c0_4] : memref<1x512xf32, #tpu.memory_space<vmem>>, vector<1x512xf32>
    %4 = vector.broadcast %3 : vector<1x512xf32> to vector<8x512xf32>
    %5 = arith.addf %2, %4 : vector<8x512xf32>
    %6 = vector.extract_strided_slice %5 {offsets = [0, 0], sizes = [8, 128], strides = [1, 1]} : vector<8x512xf32> to vector<8x128xf32>
    %7 = arith.negf %6 : vector<8x128xf32>
    %8 = math.exp %7 : vector<8x128xf32>
    %cst_5 = arith.constant 1.000000e+00 : f32
    %9 = vector.broadcast %cst_5 : f32 to vector<8x128xf32>
    %10 = arith.addf %9, %8 : vector<8x128xf32>
    %11 = arith.divf %9, %10 : vector<8x128xf32>
    %12 = vector.extract_strided_slice %5 {offsets = [0, 128], sizes = [8, 128], strides = [1, 1]} : vector<8x512xf32> to vector<8x128xf32>
    %13 = arith.negf %12 : vector<8x128xf32>
    %14 = math.exp %13 : vector<8x128xf32>
    %cst_6 = arith.constant 1.000000e+00 : f32
    %15 = vector.broadcast %cst_6 : f32 to vector<8x128xf32>
    %16 = arith.addf %15, %14 : vector<8x128xf32>
    %17 = arith.divf %15, %16 : vector<8x128xf32>
    %18 = vector.extract_strided_slice %5 {offsets = [0, 256], sizes = [8, 128], strides = [1, 1]} : vector<8x512xf32> to vector<8x128xf32>
    %19 = math.tanh %18 : vector<8x128xf32>
    %20 = vector.extract_strided_slice %5 {offsets = [0, 384], sizes = [8, 128], strides = [1, 1]} : vector<8x512xf32> to vector<8x128xf32>
    %21 = arith.negf %20 : vector<8x128xf32>
    %22 = math.exp %21 : vector<8x128xf32>
    %cst_7 = arith.constant 1.000000e+00 : f32
    %23 = vector.broadcast %cst_7 : f32 to vector<8x128xf32>
    %24 = arith.addf %23, %22 : vector<8x128xf32>
    %25 = arith.divf %23, %24 : vector<8x128xf32>
    %c0_8 = arith.constant 0 : index
    %c0_9 = arith.constant 0 : index
    %26 = vector.load %arg1[%c0_8, %c0_9] : memref<8x128xf32, #tpu.memory_space<vmem>>, vector<8x128xf32>
    %27 = arith.mulf %11, %26 : vector<8x128xf32>
    %28 = arith.mulf %17, %19 : vector<8x128xf32>
    %29 = arith.addf %27, %28 : vector<8x128xf32>
    %30 = math.tanh %29 : vector<8x128xf32>
    %31 = arith.mulf %25, %30 : vector<8x128xf32>
    %c0_10 = arith.constant 0 : index
    %c0_11 = arith.constant 0 : index
    %32 = vector.load %arg5[%c0_10, %c0_11] : memref<8x128xf32, #tpu.memory_space<vmem>>, vector<8x128xf32>
    tpu.vector_store %arg5[%c0_10, %c0_11], %29 {strides = array<i32>} : memref<8x128xf32, #tpu.memory_space<vmem>>, vector<8x128xf32>,
    %c0_12 = arith.constant 0 : index
    %c0_13 = arith.constant 0 : index
    %33 = vector.load %arg4[%c0_12, %c0_13] : memref<8x128xf32, #tpu.memory_space<vmem>>, vector<8x128xf32>
    tpu.vector_store %arg4[%c0_12, %c0_13], %31 {strides = array<i32>} : memref<8x128xf32, #tpu.memory_space<vmem>>, vector<8x128xf32>,
    return
  }
}

</mosaic_0001>

<bundles_post_ra>
// kernel: tpu_custom_call.1
= control target key start
LH: loop header
LB: loop body
LE: loop exit
PB: predicated region body
PF: predicated region fallthrough
CT: control target
= control target key end

     0   :  { %11 = vsyncpa [#allocation3], 0  ;;  %s543_s0 = inlined_call_operand.hbm [shape: f32[8,48], index: 0, kind: input, shape index: {}]   ;;  %s544_s1 = inlined_call_operand.hbm [shape: f32[8,128], index: 1, kind: input, shape index: {}]   ;;  %s545_s2 = inlined_call_operand.hbm [shape: f32[48,512], index: 2, kind: input, shape index: {}]   ;;  %s546_s3 = inlined_call_operand.hbm [shape: f32[1,512], index: 3, kind: input, shape index: {}]   ;;  %s547_s4 = inlined_call_operand.hbm [shape: f32[8,128], index: 4, kind: output, shape index: {0}]   ;;  %s548_s5 = inlined_call_operand.hbm [shape: f32[8,128], index: 5, kind: output, shape index: {1}]  }
   0x1   :  { %12 = vsyncpa [#allocation6], 0 }
   0x2   :  { %13 = vsyncpa [#allocation9], 0 }
   0x3   :  { %14 = vsyncpa [#allocation4], 0  ;;  %s32_s20 = sshll.u32 %s544_s1, 4  ;;  %s33_s20 = int_to_ptr.hbm [resolvable:$true] %s32_s20 }
   0x4   :  { %15 = vsyncpa [#allocation12], 0  ;;  %s483_s21 = smov [#allocation5]   ;;  %s21_s25 = sshll.u32 %s543_s0, 4  ;;  %s22_s25 = int_to_ptr.hbm [resolvable:$true] %s21_s25 }
   0x5   :  { %s34_s22 = sshll.u32 %s483_s21, 4  ;;  %s484_s26 = smov [#allocation2]   ;;  %s35_s22 = int_to_ptr.vmem [resolvable:$true] %s34_s22 }
   0x6   :  { %37 = dma.hbm_to_vmem [thread:$0]  %s33_s20, 128, %s35_s22, [#allocation6]  }
   0x7   :  { %s23_s27 = sshll.u32 %s484_s26, 4  ;;  %s42_s30 = sshll.u32 %s545_s2, 4  ;;  %s24_s27 = int_to_ptr.vmem [resolvable:$true] %s23_s27  ;;  %s43_s30 = int_to_ptr.hbm [resolvable:$true] %s42_s30 }
   0x8   :  { %26 = dma.hbm_to_vmem [thread:$0]  %s22_s25, 128, %s24_s27, [#allocation3]  }
   0x9   :  { %s485_s1 = smov [#allocation7]   ;;  %s56_s9 = sshll.u32 %s546_s3, 4  ;;  %s57_s9 = int_to_ptr.hbm [resolvable:$true] %s56_s9 }
   0xa   :  { %s44_s6 = sshll.u32 %s485_s1, 4  ;;  %s486_s10 = smov 512   ;;  %s45_s6 = int_to_ptr.vmem [resolvable:$true] %s44_s6 }
   0xb   :  { %s487_s0 = smov 32   ;;  %s488_s11 = smov [#allocation8]  }
   0xc   :  { %50 = dma.hbm_to_vmem [thread:$0]  %s43_s30, 3072, %s45_s6, [#allocation6], %s486_s10, %s486_s10, %s487_s0  }
   0xd   :  { %s58_s12 = sshll.u32 %s488_s11, 4  ;;  %s59_s12 = int_to_ptr.vmem [resolvable:$true] %s58_s12 }
   0xe   :  { %61 = dma.hbm_to_vmem [thread:$0]  %s57_s9, 64, %s59_s12, [#allocation9]  }
   0xf   :  { %473 = dma.done.wait [#allocation3], 128  }
  0x10   :  { %474 = vsyncadd [#allocation3], 4294967168 }
  0x11   :  { %475 = dma.done.wait [#allocation6], 3200  }
  0x12   :  { %476 = vsyncadd [#allocation6], 4294964096 }
  0x13   :  { %477 = dma.done.wait [#allocation9], 64  }
  0x14   :  { %478 = vsyncadd [#allocation9], 4294967232  ;;  %v99_v0 = vld [vmem:[#allocation7 + $0xa0] sm:$0xff]  ;;  %v100_v1 = vld [vmem:[#allocation7 + $0xa8] sm:$0xff]  ;;  %vm113_vm0 = vcmask 392192   ;;  %s489_s2 = smov [#allocation11]  }
  0x15   :  { %v102_v2 = vld [vmem:[#allocation7 + $0xb8] sm:$0xff]  ;;  %127 = vmatpush.msra.mxu0 %v99_v0  ;;  %147 = vmatpush.msra.mxu1 %v100_v1  ;;  %v95_v3 = vld [vmem:[#allocation7 + $0x80] sm:$0xff]  ;;  %v96_v4 = vld [vmem:[#allocation7 + $0x88] sm:$0xff]  ;;  %s279_s3 = sshll.u32 %s489_s2, 4  ;;  %s281_s15 = sshll.u32 %s548_s5, 4  ;;  %s280_s3 = int_to_ptr.vmem [resolvable:$true] %s279_s3  ;;  %s282_s15 = int_to_ptr.hbm [resolvable:$true] %s281_s15 }
  0x16   :  { %v98_v5 = vld [vmem:[#allocation7 + $0x98] sm:$0xff]  ;;  %187 = vmatpush.msra.mxu3 %v102_v2  ;;  %v91_v6 = vld [vmem:[#allocation7 + $0x60] sm:$0xff]  ;;  %v92_v7 = vld [vmem:[#allocation7 + $0x68] sm:$0xff]  ;;  %s490_s16 = smov [#allocation10]   ;;  %s270_s19 = sshll.u32 %s547_s4, 4  ;;  %s271_s19 = int_to_ptr.hbm [resolvable:$true] %s270_s19 }
  0x17   :  { %128 = vmatpush.msra.mxu0 %v95_v3  ;;  %148 = vmatpush.msra.mxu1 %v96_v4  ;;  %v94_v8 = vld [vmem:[#allocation7 + $0x78] sm:$0xff]  ;;  %v87_v9 = vld [vmem:[#allocation7 + $0x40] sm:$0xff]  ;;  %v88_v10 = vld [vmem:[#allocation7 + $0x48] sm:$0xff]  ;;  %s268_s17 = sshll.u32 %s490_s16, 4  ;;  %s269_s17 = int_to_ptr.vmem [resolvable:$true] %s268_s17 }
  0x18   :  { %188 = vmatpush.msra.mxu3 %v98_v5  ;;  %v90_v11 = vld [vmem:[#allocation7 + $0x58] sm:$0xff]  ;;  %v83_v12 = vld [vmem:[#allocation7 + $0x20] sm:$0xff]  ;;  %v84_v13 = vld [vmem:[#allocation7 + $0x28] sm:$0xff] }
  0x19   :  { %129 = vmatpush.msra.mxu0 %v91_v6  ;;  %149 = vmatpush.msra.mxu1 %v92_v7  ;;  %v101_v14 = vld [vmem:[#allocation7 + $0xb0] sm:$0xff]  ;;  %v86_v15 = vld [vmem:[#allocation7 + $0x38] sm:$0xff]  ;;  %v79_v17 = vld [vmem:[#allocation7] sm:$0xff] }
  0x1a   :  { %189 = vmatpush.msra.mxu3 %v94_v8  ;;  %v97_v16 = vld [vmem:[#allocation7 + $0x90] sm:$0xff]  ;;  %v80_v18 = vld [vmem:[#allocation7 + $0x8] sm:$0xff]  ;;  %167 = vmatpush.msra.mxu2 %v101_v14  ;;  %v82_v19 = vld [vmem:[#allocation7 + $0x18] sm:$0xff] }
  0x1b   :  { %130 = vmatpush.msra.mxu0 %v87_v9  ;;  %150 = vmatpush.msra.mxu1 %v88_v10  ;;  %v78_v20 = vld [vmem:[#allocation2] sm:$0xff]  ;;  %v103_v25 = vld [vmem:[#allocation8] sm:$0xf]  ;;  %v255_v0 = vld [vmem:[#allocation5] sm:$0xff] }
  0x1c   :  { %190 = vmatpush.msra.mxu3 %v90_v11  ;;  %168 = vmatpush.msra.mxu2 %v97_v16  ;;  %v93_v21 = vld [vmem:[#allocation7 + $0x70] sm:$0xff]  ;;  %v105_v26 = vperm.slane %v103_v25, 0  ;;  %v106_v27 = vperm.slane %v103_v25, 1  ;;  %v108_v34 = vperm.slane %v103_v25, 3  ;;  %v107_v42 = vperm.slane %v103_v25, 2 }
  0x1d   :  { %131 = vmatpush.msra.mxu0 %v83_v12  ;;  %151 = vmatpush.msra.mxu1 %v84_v13  ;;  %v89_v22 = vld [vmem:[#allocation7 + $0x50] sm:$0xff] }
  0x1e   :  { %191 = vmatpush.msra.mxu3 %v86_v15  ;;  %169 = vmatpush.msra.mxu2 %v93_v21  ;;  %v85_v23 = vld [vmem:[#allocation7 + $0x30] sm:$0xff] }
  0x1f   :  { %132 = vmatpush.msra.mxu0 %v79_v17  ;;  %152 = vmatpush.msra.mxu1 %v80_v18  ;;  %v81_v24 = vld [vmem:[#allocation7 + $0x10] sm:$0xff] }
  0x20   :  { %192 = vmatpush.msra.mxu3 %v82_v19  ;;  %298 = vmatmul.msk.f32.vlgmr.msra.gmra.mxu0 %vm113_vm0, %v78_v20 }
  0x21   :  { %299 = vmatmul.msk.f32.vlgmr.msra.gmra.mxu1 %vm113_vm0, %v78_v20  ;;  %301 = vmatmul.msk.f32.vlgmr.msra.gmra.mxu3 %vm113_vm0, %v78_v20 }
  0x22   :  { %170 = vmatpush.msra.mxu2 %v89_v22 }
  0x24   :  { %171 = vmatpush.msra.mxu2 %v85_v23 }
  0x26   :  { %172 = vmatpush.msra.mxu2 %v81_v24 }
  0x27   :  { %300 = vmatmul.msk.f32.vlgmr.msra.gmra.mxu2 %vm113_vm0, %v78_v20 }
  0x9d   :  { %v134_v28 = vpop.f32.mrf.mxu0 }
  0x9e   :  { %v135_v29 = vadd.f32 %v134_v28, %v105_v26  ;;  %v154_v30 = vpop.f32.mrf.mxu1 }
  0x9f   :  { %v155_v31 = vadd.f32 %v154_v30, %v106_v27 }
  0xa0   :  { %v302_v32 = vmul.f32 -1.442695, %v135_v29 }
  0xa1   :  { %v303_v33 = vmul.f32 -1.442695, %v155_v31 }
  0xa2   :  { %313 = vpow2.f32 %v302_v32 }
  0xa3   :  { %315 = vpow2.f32 %v303_v33 }
  0xa4   :  { %v194_v35 = vpop.f32.mrf.mxu3 }
  0xa5   :  { %v195_v36 = vadd.f32 %v194_v35, %v108_v34 }
  0xa7   :  { %v304_v37 = vmul.f32 -1.442695, %v195_v36 }
  0xa8   :  { %v314_v38 = vpop.eup %313 }
  0xa9   :  { %v316_v39 = vpop.eup %315  ;;  %v200_v40 = vadd.f32 1.0, %v314_v38  ;;  %317 = vpow2.f32 %v304_v37 }
  0xaa   :  { %v219_v41 = vadd.f32 1.0, %v316_v39  ;;  %v174_v43 = vpop.f32.mrf.mxu2 }
  0xab   :  { %319 = vrcp.f32 %v200_v40  ;;  %v175_v46 = vadd.f32 %v174_v43, %v107_v42  ;;  %v212_v52 = vand.u32 2147483648, %v200_v40  ;;  %v210_v55 = vand.u32 2147483647, %v200_v40 }
  0xac   :  { %321 = vrcp.f32 %v219_v41  ;;  %v231_v56 = vand.u32 2147483648, %v219_v41  ;;  %v229_v58 = vand.u32 2147483647, %v219_v41  ;;  %vm206_vm3 = vweird.f32 %v200_v40 }
  0xad   :  { %v213_v61 = vor.u32 1.1754944e-38, %v212_v52  ;;  %vm225_vm5 = vweird.f32 %v219_v41  ;;  %vm211_vm6 = vcmp.eq.f32.partialorder %v210_v55, 8.507059e+37 }
  0xae   :  { %v232_v3 = vor.u32 1.1754944e-38, %v231_v56  ;;  %vm230_vm8 = vcmp.eq.f32.partialorder %v229_v58, 8.507059e+37 }
  0xaf   :  { %v318_v44 = vpop.eup %317 }
  0xb0   :  { %v239_v45 = vadd.f32 1.0, %v318_v44 }
  0xb1   :  { %v320_v47 = vpop.eup %319 }
  0xb2   :  { %v322_v48 = vpop.eup %321  ;;  %v202_v49 = vmul.f32 %v320_v47, %v200_v40  ;;  %323 = vrcp.f32 %v239_v45  ;;  %vm207_vm1 = vweird.f32 %v320_v47  ;;  %v251_v13 = vand.u32 2147483648, %v239_v45 }
  0xb3   :  { %v221_v50 = vmul.f32 %v322_v48, %v219_v41  ;;  %325 = vtanh.f32 %v175_v46  ;;  %vm226_vm2 = vweird.f32 %v322_v48  ;;  %vm208_vm4 = vmor %vm206_vm3, %vm207_vm1  ;;  %vm245_vm10 = vweird.f32 %v239_v45 }
  0xb4   :  { %v203_v51 = vsub.f32 1.0, %v202_v49  ;;  %vm227_vm7 = vmor %vm225_vm5, %vm226_vm2  ;;  %v249_v14 = vand.u32 2147483647, %v239_v45  ;;  %v252_v16 = vor.u32 1.1754944e-38, %v251_v13 }
  0xb5   :  { %v222_v53 = vsub.f32 1.0, %v221_v50 }
  0xb6   :  { %v204_v54 = vmul.f32 %v320_v47, %v203_v51  ;;  %vm250_vm12 = vcmp.eq.f32.partialorder %v249_v14, 8.507059e+37 }
  0xb7   :  { %v223_v57 = vmul.f32 %v322_v48, %v222_v53 }
  0xb8   :  { %v324_v59 = vpop.eup %323  ;;  %v205_v60 = vadd.f32 %v320_v47, %v204_v54 }
  0xb9   :  { %v241_v62 = vmul.f32 %v324_v59, %v239_v45  ;;  %v224_v63 = vadd.f32 %v322_v48, %v223_v57  ;;  %v326_v1 = vpop.eup %325  ;;  %vm246_vm9 = vweird.f32 %v324_v59 }
  0xba   :  { %v209_v2 = vsel %vm208_vm4, %v320_v47, %v205_v60  ;;  %vm247_vm11 = vmor %vm245_vm10, %vm246_vm9 }
  0xbb   :  { %v242_v4 = vsub.f32 1.0, %v241_v62  ;;  %v214_v5 = vsel %vm211_vm6, %v213_v61, %v209_v2  ;;  %v228_v6 = vsel %vm227_vm7, %v322_v48, %v224_v63 }
  0xbc   :  { %v233_v7 = vsel %vm230_vm8, %v232_v3, %v228_v6  ;;  %v256_v8 = vmul.f32 %v255_v0, %v214_v5 }
  0xbd   :  { %v257_v9 = vmul.f32 %v326_v1, %v233_v7  ;;  %v243_v10 = vmul.f32 %v324_v59, %v242_v4 }
  0xbf   :  { %v258_v11 = vadd.f32 %v257_v9, %v256_v8  ;;  %v244_v12 = vadd.f32 %v324_v59, %v243_v10 }
  0xc1   :  { %327 = vtanh.f32 %v258_v11  ;;  %261 = vst [vmem:[#allocation11] sm:$0xff] %v258_v11  ;;  %v248_v15 = vsel %vm247_vm11, %v324_v59, %v244_v12 }
  0xc2   :  { %284 = dma.vmem_to_hbm [thread:$0]  %s280_s3, 128, %s282_s15, [#allocation12]   ;;  %v253_v18 = vsel %vm250_vm12, %v252_v16, %v248_v15 }
  0xc7   :  { %v328_v17 = vpop.eup %327 }
  0xc8   :  { %v260_v19 = vmul.f32 %v328_v17, %v253_v18 }
  0xca   :  { %262 = vst [vmem:[#allocation10] sm:$0xff] %v260_v19 }
  0xcb   :  { %273 = dma.vmem_to_hbm [thread:$0]  %s269_s17, 128, %s271_s19, [#allocation4]  }
  0xcc   :  { %479 = dma.done.wait [#allocation4], 128  }
  0xcd   :  { %480 = vsyncadd [#allocation4], 4294967168 }
  0xce   :  { %481 = dma.done.wait [#allocation12], 128  }
  0xcf   :  { %482 = vsyncadd [#allocation12], 4294967168 }
  0xd0   :  { %293 = vsyncpa [#allocation3], 1 }
  0xd1   :  { %294 = vsyncpa [#allocation6], 1 }
  0xd2   :  { %295 = vsyncpa [#allocation9], 1 }
  0xd3   :  { %296 = vsyncpa [#allocation4], 1 }
  0xd4   :  { %297 = vsyncpa [#allocation12], 1 }

</bundles_post_ra>
